<compile_context>
chip_gen: v7x
topology: tpu7x:2x2x1
jax: 0.10.0
libtpu: 0.0.40
codegen_flags: <defaults>
</compile_context>

<pallas_src>
import functools

import jax
import jax.numpy as jnp
from jax.experimental import pallas as pl
from jax.experimental.pallas import tpu as pltpu

LN_EPS = 1e-5  # nn.LayerNorm default


def _round_up(x, m):
    return ((x + m - 1) // m) * m


def _mlp_kernel(x_ref, gamma_ref, beta_ref, w1_ref, b1_ref, w2_ref, b2_ref,
                o_ref, xn_ref, *acc_scratch,
                d_actual, mask_lanes, n_j, approx_gelu):
    # Grid: (row tile i [parallel], hidden tile j [arbitrary]).
    # x / out / gamma / beta / b2 are j-invariant; w1/b1/w2 are tiled over j (n_j==1 in
    # the resident-weight fast path, so they are fetched once for the whole grid).
    j = pl.program_id(1)

    @pl.when(j == 0)
    def _layernorm():
        x = x_ref[...].astype(jnp.float32)
        inv_d = 1.0 / d_actual
        # Padded lanes (if any) are zero, so the sum over Dp equals the sum over D.
        mean = jnp.sum(x, axis=-1, keepdims=True) * inv_d
        diff = x - mean
        if mask_lanes:
            lane = jax.lax.broadcasted_iota(jnp.int32, diff.shape, 1)
            diff = jnp.where(lane < d_actual, diff, 0.0)
        var = jnp.sum(diff * diff, axis=-1, keepdims=True) * inv_d
        xn = diff * jax.lax.rsqrt(var + LN_EPS)
        xn = xn * gamma_ref[...].astype(jnp.float32) + beta_ref[...].astype(jnp.float32)
        xn_ref[...] = xn.astype(xn_ref.dtype)   # compute dtype (bf16 by default)

    # Linear(dim, mlp_dim) tile: bf16 (or f32) operands, f32 MXU accumulation.
    h = jnp.dot(xn_ref[...], w1_ref[...], preferred_element_type=jnp.float32)
    h = h + b1_ref[...].astype(jnp.float32)
    # GELU in f32: approximate=True -> tanh on the EUP slot (default, cheap);
    # approximate=False -> exact erf (nn.GELU default numerics).
    h = jax.nn.gelu(h, approximate=approx_gelu)
    # Dropout: identity (eval mode).
    part = jnp.dot(h.astype(w2_ref.dtype), w2_ref[...],
                   preferred_element_type=jnp.float32)

    if n_j == 1:
        # Resident-weight fast path: no accumulator round-trip.
        y = part + b2_ref[...].astype(jnp.float32) + x_ref[...].astype(jnp.float32)
        o_ref[...] = y.astype(o_ref.dtype)
    else:
        acc_ref = acc_scratch[0]

        @pl.when(j == 0)
        def _():
            acc_ref[...] = part

        @pl.when(j > 0)
        def _():
            acc_ref[...] += part

        @pl.when(j == pl.num_programs(1) - 1)
        def _():
            y = acc_ref[...] + b2_ref[...].astype(jnp.float32) + x_ref[...].astype(jnp.float32)
            o_ref[...] = y.astype(o_ref.dtype)


@functools.partial(jax.jit,
                   static_argnames=("tm", "th", "compute_dtype", "gelu_approximate"))
def mlp_layer_forward(x, gamma, beta, w1, b1, w2, b2, *,
                      tm=512, th=None,
                      compute_dtype=jnp.bfloat16, gelu_approximate=True):
    B, N, D = x.shape
    H = w1.shape[1]
    M = B * N
    cdt = jnp.dtype(compute_dtype)
    wsize = cdt.itemsize
    xsize = x.dtype.itemsize

    Dp = _round_up(D, 128)            # lane-dense last dim
    Hp128 = _round_up(H, 128)

    # Row tile: large by default; ensure >=2 row tiles when possible so the "parallel"
    # axis can shard across v7x's two TensorCores.
    tm_eff = min(tm, _round_up(M, 16))
    if M > 16 and _round_up(M, tm_eff) // tm_eff < 2:
        tm_eff = _round_up((M + 1) // 2, 16)
    Mp = _round_up(M, tm_eff)

    # VMEM plan (bytes).  Budget leaves headroom under v7x's 64 MiB physical VMEM.
    VMEM_BUDGET = 44 * 1024 * 1024

    def act_bytes(th_like, with_acc):
        b = 2 * tm_eff * Dp * xsize          # x tile (double buffered)
        b += 2 * tm_eff * Dp * xsize         # out tile (double buffered)
        b += tm_eff * Dp * wsize             # xn scratch (compute dtype)
        b += 2 * 2 * Dp * 4                  # gamma, beta
        b += 2 * (th_like + Dp) * 4          # b1 tile, b2
        if with_acc:
            b += tm_eff * Dp * 4             # f32 accumulator scratch
        return b

    resident_bytes = act_bytes(Hp128, False) + 2 * 2 * Dp * Hp128 * wsize

    if th is None and resident_bytes <= VMEM_BUDGET:
        th_eff = Hp128                       # single hidden step -> weights resident
    elif th is None:
        avail = VMEM_BUDGET - act_bytes(0, True)
        th_eff = max(256, (avail // (2 * 3 * Dp * wsize)) // 128 * 128)
        th_eff = min(th_eff, Hp128)
    else:
        th_eff = min(max(128, _round_up(th, 128)), Hp128)

    Hp = _round_up(H, th_eff)
    n_j = Hp // th_eff
    streaming = n_j > 1

    w_bufs = 3 if streaming else 2
    need = act_bytes(th_eff, streaming) + w_bufs * 2 * Dp * th_eff * wsize
    vmem_limit = int(min(max(need + 6 * 1024 * 1024, 32 * 1024 * 1024),
                         48 * 1024 * 1024))

    # Zero-pad; padded lanes/rows stay exactly zero through the pipeline and are sliced off.
    x2d = jnp.pad(x.reshape(M, D), ((0, Mp - M), (0, Dp - D)))
    gamma2 = jnp.pad(gamma.reshape(1, D).astype(jnp.float32), ((0, 0), (0, Dp - D)))
    beta2 = jnp.pad(beta.reshape(1, D).astype(jnp.float32), ((0, 0), (0, Dp - D)))
    w1p = jnp.pad(w1.astype(cdt), ((0, Dp - D), (0, Hp - H)))
    b1p = jnp.pad(b1.reshape(1, H).astype(jnp.float32), ((0, 0), (0, Hp - H)))
    w2p = jnp.pad(w2.astype(cdt), ((0, Hp - H), (0, Dp - D)))
    b2p = jnp.pad(b2.reshape(1, D).astype(jnp.float32), ((0, 0), (0, Dp - D)))

    if streaming:
        # Streamed-weight fallback: deepen prefetch to hide exposed weight DMA latency.
        w1_spec = pl.BlockSpec((Dp, th_eff), lambda i, j: (0, j),
                               pipeline_mode=pl.Buffered(3))
        w2_spec = pl.BlockSpec((th_eff, Dp), lambda i, j: (j, 0),
                               pipeline_mode=pl.Buffered(3))
    else:
        # Constant block index across the whole grid -> weights fetched once, stay resident.
        w1_spec = pl.BlockSpec((Dp, th_eff), lambda i, j: (0, j))
        w2_spec = pl.BlockSpec((th_eff, Dp), lambda i, j: (j, 0))

    in_specs = [
        pl.BlockSpec((tm_eff, Dp), lambda i, j: (i, 0)),   # x rows (j-invariant)
        pl.BlockSpec((1, Dp), lambda i, j: (0, 0)),        # LN gamma
        pl.BlockSpec((1, Dp), lambda i, j: (0, 0)),        # LN beta
        w1_spec,                                           # w1
        pl.BlockSpec((1, th_eff), lambda i, j: (0, j)),    # b1 tile
        w2_spec,                                           # w2
        pl.BlockSpec((1, Dp), lambda i, j: (0, 0)),        # b2
    ]

    scratch_shapes = [pltpu.VMEM((tm_eff, Dp), cdt)]       # normalized rows
    if streaming:
        scratch_shapes.append(pltpu.VMEM((tm_eff, Dp), jnp.float32))  # f32 accumulator

    kernel = functools.partial(
        _mlp_kernel,
        d_actual=D,
        mask_lanes=(Dp != D),
        n_j=n_j,
        approx_gelu=gelu_approximate,
    )

    out2d = pl.pallas_call(
        kernel,
        out_shape=jax.ShapeDtypeStruct((Mp, Dp), x.dtype),
        grid_spec=pltpu.PrefetchScalarGridSpec(
            num_scalar_prefetch=0,
            grid=(Mp // tm_eff, n_j),
            in_specs=in_specs,
            out_specs=pl.BlockSpec((tm_eff, Dp), lambda i, j: (i, 0)),
            scratch_shapes=scratch_shapes,
        ),
        compiler_params=pltpu.CompilerParams(
            dimension_semantics=("parallel", "arbitrary"),
            vmem_limit_bytes=vmem_limit,
        ),
    )(x2d, gamma2, beta2, w1p, b1p, w2p, b2p)

    return out2d[:M, :D].reshape(B, N, D)


def reference_forward(x, gamma, beta, w1, b1, w2, b2):
    # Pure-JAX reference of the PyTorch module (eval mode: dropout = identity, erf GELU).
    xf = x.astype(jnp.float32)
    mean = jnp.mean(xf, axis=-1, keepdims=True)
    var = jnp.mean((xf - mean) ** 2, axis=-1, keepdims=True)
    xn = (xf - mean) / jnp.sqrt(var + LN_EPS) * gamma + beta
    h = jax.nn.gelu(xn @ w1 + b1, approximate=False)
    y = h @ w2 + b2
    return (y + xf).astype(x.dtype)


if __name__ == "__main__":
    # Small shapes consistent with a ViT token MLP: batch=2, seq=8, dim=32, mlp_dim=64.
    B, N, DIM, MLP_DIM = 2, 8, 32, 64

    key = jax.random.PRNGKey(0)
    kx, kw1, kb1, kw2, kb2 = jax.random.split(key, 5)

    x = jax.random.normal(kx, (B, N, DIM), dtype=jnp.float32)
    gamma = jnp.ones((DIM,), dtype=jnp.float32)
    beta = jnp.zeros((DIM,), dtype=jnp.float32)
    w1 = jax.random.normal(kw1, (DIM, MLP_DIM), dtype=jnp.float32) * (1.0 / DIM ** 0.5)
    b1 = jax.random.normal(kb1, (MLP_DIM,), dtype=jnp.float32) * 0.01
    w2 = jax.random.normal(kw2, (MLP_DIM, DIM), dtype=jnp.float32) * (1.0 / MLP_DIM ** 0.5)
    b2 = jax.random.normal(kb2, (DIM,), dtype=jnp.float32) * 0.01

    ref = reference_forward(x, gamma, beta, w1, b1, w2, b2)

    # 1) Default fast path: resident weights, bf16 MXU operands, tanh-GELU on the EUP.
    out = jax.block_until_ready(mlp_layer_forward(x, gamma, beta, w1, b1, w2, b2))
    assert out.shape == x.shape and out.dtype == x.dtype
    assert jnp.allclose(out, ref, atol=5e-2, rtol=5e-2), "fast-path mismatch vs reference"

    # 2) Exact-parity path: f32 operands + erf GELU -> tight match with PyTorch semantics.
    out_exact = jax.block_until_ready(
        mlp_layer_forward(x, gamma, beta, w1, b1, w2, b2,
                          compute_dtype=jnp.float32, gelu_approximate=False))
    assert jnp.allclose(out_exact, ref, atol=1e-4, rtol=1e-4), "exact-path mismatch"

    # 3) Streamed-weight fallback path (hidden axis tiled, Buffered(3), f32 accumulator).
    H2 = 512
    w1b = jax.random.normal(kw1, (DIM, H2), dtype=jnp.float32) * (1.0 / DIM ** 0.5)
    b1b = jax.random.normal(kb1, (H2,), dtype=jnp.float32) * 0.01
    w2b = jax.random.normal(kw2, (H2, DIM), dtype=jnp.float32) * (1.0 / H2 ** 0.5)
    b2b = jax.random.normal(kb2, (DIM,), dtype=jnp.float32) * 0.01
    ref2 = reference_forward(x, gamma, beta, w1b, b1b, w2b, b2b)
    out2 = jax.block_until_ready(
        mlp_layer_forward(x, gamma, beta, w1b, b1b, w2b, b2b, th=128,
                          compute_dtype=jnp.float32, gelu_approximate=False))
    assert jnp.allclose(out2, ref2, atol=1e-4, rtol=1e-4), "streaming-path mismatch"

    print("KERNEL_OK")
</pallas_src>

<mosaic_0001>
module attributes {stable_mosaic.version = 11 : i64} {
  func.func @_mlp_kernel(%arg0: i32, %arg1: i32, %arg2: memref<16x128xf32, #tpu.memory_space<vmem>>, %arg3: memref<1x128xf32, #tpu.memory_space<vmem>>, %arg4: memref<1x128xf32, #tpu.memory_space<vmem>>, %arg5: memref<128x128xbf16, #tpu.memory_space<vmem>>, %arg6: memref<1x128xf32, #tpu.memory_space<vmem>>, %arg7: memref<128x128xbf16, #tpu.memory_space<vmem>>, %arg8: memref<1x128xf32, #tpu.memory_space<vmem>>, %arg9: memref<16x128xf32, #tpu.memory_space<vmem>>, %arg10: memref<16x128xbf16, #tpu.memory_space<vmem>>) attributes {dimension_semantics = [#tpu.dimension_semantics<parallel>, #tpu.dimension_semantics<arbitrary>], iteration_bounds = array<i64: 1, 1>, scalar_prefetch = 0 : i64, scratch_operands = 1 : i64, tpu.core_type = #tpu.core_type<tc>, window_params = [{transform_indices = @transform_0, window_bounds = array<i64: 16, 128>}, {pipeline_mode = #tpu.pipeline_mode<synchronous>, transform_indices = @transform_1, window_bounds = array<i64: 1, 128>}, {pipeline_mode = #tpu.pipeline_mode<synchronous>, transform_indices = @transform_2, window_bounds = array<i64: 1, 128>}, {transform_indices = @transform_3, window_bounds = array<i64: 128, 128>}, {transform_indices = @transform_4, window_bounds = array<i64: 1, 128>}, {transform_indices = @transform_5, window_bounds = array<i64: 128, 128>}, {pipeline_mode = #tpu.pipeline_mode<synchronous>, transform_indices = @transform_6, window_bounds = array<i64: 1, 128>}, {transform_indices = @transform_7, window_bounds = array<i64: 16, 128>}]} {
    %c0_i32 = arith.constant 0 : i32
    %0 = arith.cmpi eq, %arg1, %c0_i32 : i32
    %1 = arith.extui %0 : i1 to i32
    %c0_i32_0 = arith.constant 0 : i32
    %2 = arith.cmpi ne, %1, %c0_i32_0 : i32
    scf.if %2 {
      %c0_19 = arith.constant 0 : index
      %c0_20 = arith.constant 0 : index
      %31 = vector.load %arg2[%c0_19, %c0_20] : memref<16x128xf32, #tpu.memory_space<vmem>>, vector<16x128xf32>
      %cst_21 = arith.constant dense<0.000000e+00> : vector<16xf32>
      %32 = vector.multi_reduction <add>, %31, %cst_21 [1] : vector<16x128xf32> to vector<16xf32>
      %33 = vector.shape_cast %32 : vector<16xf32> to vector<16x1xf32>
      %cst_22 = arith.constant 3.125000e-02 : f32
      %34 = vector.broadcast %cst_22 : f32 to vector<16x1xf32>
      %35 = arith.mulf %33, %34 : vector<16x1xf32>
      %36 = vector.broadcast %35 : vector<16x1xf32> to vector<16x128xf32>
      %37 = arith.subf %31, %36 : vector<16x128xf32>
      %38 = tpu.iota {dimensions = array<i32: 1>} : vector<16x128xi32>
      %c32_i32 = arith.constant 32 : i32
      %39 = vector.broadcast %c32_i32 : i32 to vector<16x128xi32>
      %40 = arith.cmpi slt, %38, %39 : vector<16x128xi32>
      %cst_23 = arith.constant 0.000000e+00 : f32
      %41 = vector.broadcast %cst_23 : f32 to vector<16x128xf32>
      %42 = arith.select %40, %37, %41 : vector<16x128xi1>, vector<16x128xf32>
      %43 = arith.mulf %42, %42 : vector<16x128xf32>
      %cst_24 = arith.constant dense<0.000000e+00> : vector<16xf32>
      %44 = vector.multi_reduction <add>, %43, %cst_24 [1] : vector<16x128xf32> to vector<16xf32>
      %45 = vector.shape_cast %44 : vector<16xf32> to vector<16x1xf32>
      %cst_25 = arith.constant 3.125000e-02 : f32
      %46 = vector.broadcast %cst_25 : f32 to vector<16x1xf32>
      %47 = arith.mulf %45, %46 : vector<16x1xf32>
      %cst_26 = arith.constant 9.99999974E-6 : f32
      %48 = vector.broadcast %cst_26 : f32 to vector<16x1xf32>
      %49 = arith.addf %47, %48 : vector<16x1xf32>
      %50 = math.rsqrt %49 : vector<16x1xf32>
      %51 = vector.broadcast %50 : vector<16x1xf32> to vector<16x128xf32>
      %52 = arith.mulf %42, %51 : vector<16x128xf32>
      %c0_27 = arith.constant 0 : index
      %c0_28 = arith.constant 0 : index
      %53 = vector.load %arg3[%c0_27, %c0_28] : memref<1x128xf32, #tpu.memory_space<vmem>>, vector<1x128xf32>
      %54 = vector.broadcast %53 : vector<1x128xf32> to vector<16x128xf32>
      %55 = arith.mulf %52, %54 : vector<16x128xf32>
      %c0_29 = arith.constant 0 : index
      %c0_30 = arith.constant 0 : index
      %56 = vector.load %arg4[%c0_29, %c0_30] : memref<1x128xf32, #tpu.memory_space<vmem>>, vector<1x128xf32>
      %57 = vector.broadcast %56 : vector<1x128xf32> to vector<16x128xf32>
      %58 = arith.addf %55, %57 : vector<16x128xf32>
      %59 = arith.truncf %58 : vector<16x128xf32> to vector<16x128xbf16>
      %c0_31 = arith.constant 0 : index
      %c0_32 = arith.constant 0 : index
      %60 = vector.load %arg10[%c0_31, %c0_32] : memref<16x128xbf16, #tpu.memory_space<vmem>>, vector<16x128xbf16>
      tpu.vector_store %arg10[%c0_31, %c0_32], %59 {strides = array<i32>} : memref<16x128xbf16, #tpu.memory_space<vmem>>, vector<16x128xbf16>,
    } else {
    }
    %c0 = arith.constant 0 : index
    %c0_1 = arith.constant 0 : index
    %3 = vector.load %arg10[%c0, %c0_1] : memref<16x128xbf16, #tpu.memory_space<vmem>>, vector<16x128xbf16>
    %c0_2 = arith.constant 0 : index
    %c0_3 = arith.constant 0 : index
    %4 = vector.load %arg5[%c0_2, %c0_3] : memref<128x128xbf16, #tpu.memory_space<vmem>>, vector<128x128xbf16>
    %cst = arith.constant dense<0.000000e+00> : vector<16x128xf32>
    %5 = tpu.matmul %3, %4, %cst {dimension_numbers = #tpu.dot_dimension_numbers<[1], [0], [0], [1], [0, 0, 1, 1], [], []>} : vector<16x128xbf16>, vector<128x128xbf16>, vector<16x128xf32> -> vector<16x128xf32>
    %c0_4 = arith.constant 0 : index
    %c0_5 = arith.constant 0 : index
    %6 = vector.load %arg6[%c0_4, %c0_5] : memref<1x128xf32, #tpu.memory_space<vmem>>, vector<1x128xf32>
    %7 = vector.broadcast %6 : vector<1x128xf32> to vector<16x128xf32>
    %8 = arith.addf %5, %7 : vector<16x128xf32>
    %9 = arith.mulf %8, %8 : vector<16x128xf32>
    %10 = arith.mulf %8, %9 : vector<16x128xf32>
    %cst_6 = arith.constant 4.471500e-02 : f32
    %11 = vector.broadcast %cst_6 : f32 to vector<16x128xf32>
    %12 = arith.mulf %11, %10 : vector<16x128xf32>
    %13 = arith.addf %8, %12 : vector<16x128xf32>
    %cst_7 = arith.constant 0.797884583 : f32
    %14 = vector.broadcast %cst_7 : f32 to vector<16x128xf32>
    %15 = arith.mulf %14, %13 : vector<16x128xf32>
    %16 = math.tanh %15 : vector<16x128xf32>
    %cst_8 = arith.constant 1.000000e+00 : f32
    %17 = vector.broadcast %cst_8 : f32 to vector<16x128xf32>
    %18 = arith.addf %17, %16 : vector<16x128xf32>
    %cst_9 = arith.constant 5.000000e-01 : f32
    %19 = vector.broadcast %cst_9 : f32 to vector<16x128xf32>
    %20 = arith.mulf %19, %18 : vector<16x128xf32>
    %21 = arith.mulf %8, %20 : vector<16x128xf32>
    %22 = arith.truncf %21 : vector<16x128xf32> to vector<16x128xbf16>
    %c0_10 = arith.constant 0 : index
    %c0_11 = arith.constant 0 : index
    %23 = vector.load %arg7[%c0_10, %c0_11] : memref<128x128xbf16, #tpu.memory_space<vmem>>, vector<128x128xbf16>
    %cst_12 = arith.constant dense<0.000000e+00> : vector<16x128xf32>
    %24 = tpu.matmul %22, %23, %cst_12 {dimension_numbers = #tpu.dot_dimension_numbers<[1], [0], [0], [1], [0, 0, 1, 1], [], []>} : vector<16x128xbf16>, vector<128x128xbf16>, vector<16x128xf32> -> vector<16x128xf32>
    %c0_13 = arith.constant 0 : index
    %c0_14 = arith.constant 0 : index
    %25 = vector.load %arg8[%c0_13, %c0_14] : memref<1x128xf32, #tpu.memory_space<vmem>>, vector<1x128xf32>
    %26 = vector.broadcast %25 : vector<1x128xf32> to vector<16x128xf32>
    %27 = arith.addf %24, %26 : vector<16x128xf32>
    %c0_15 = arith.constant 0 : index
    %c0_16 = arith.constant 0 : index
    %28 = vector.load %arg2[%c0_15, %c0_16] : memref<16x128xf32, #tpu.memory_space<vmem>>, vector<16x128xf32>
    %29 = arith.addf %27, %28 : vector<16x128xf32>
    %c0_17 = arith.constant 0 : index
    %c0_18 = arith.constant 0 : index
    %30 = vector.load %arg9[%c0_17, %c0_18] : memref<16x128xf32, #tpu.memory_space<vmem>>, vector<16x128xf32>
    tpu.vector_store %arg9[%c0_17, %c0_18], %29 {strides = array<i32>} : memref<16x128xf32, #tpu.memory_space<vmem>>, vector<16x128xf32>,
    return
  }
  func.func @transform_0(%arg0: i32, %arg1: i32) -> (i32, i32) {
    %c0_i32 = arith.constant 0 : i32
    %c0_i32_0 = arith.constant 0 : i32
    return %arg0, %c0_i32 : i32, i32
  }
  func.func @transform_1(%arg0: i32, %arg1: i32) -> (i32, i32) {
    %c0_i32 = arith.constant 0 : i32
    %c0_i32_0 = arith.constant 0 : i32
    %c0_i32_1 = arith.constant 0 : i32
    return %c0_i32, %c0_i32_0 : i32, i32
  }
  func.func @transform_2(%arg0: i32, %arg1: i32) -> (i32, i32) {
    %c0_i32 = arith.constant 0 : i32
    %c0_i32_0 = arith.constant 0 : i32
    %c0_i32_1 = arith.constant 0 : i32
    return %c0_i32, %c0_i32_0 : i32, i32
  }
  func.func @transform_3(%arg0: i32, %arg1: i32) -> (i32, i32) {
    %c0_i32 = arith.constant 0 : i32
    %c0_i32_0 = arith.constant 0 : i32
    return %c0_i32, %arg1 : i32, i32
  }
  func.func @transform_4(%arg0: i32, %arg1: i32) -> (i32, i32) {
    %c0_i32 = arith.constant 0 : i32
    %c0_i32_0 = arith.constant 0 : i32
    return %c0_i32, %arg1 : i32, i32
  }
  func.func @transform_5(%arg0: i32, %arg1: i32) -> (i32, i32) {
    %c0_i32 = arith.constant 0 : i32
    %c0_i32_0 = arith.constant 0 : i32
    return %arg1, %c0_i32 : i32, i32
  }
  func.func @transform_6(%arg0: i32, %arg1: i32) -> (i32, i32) {
    %c0_i32 = arith.constant 0 : i32
    %c0_i32_0 = arith.constant 0 : i32
    %c0_i32_1 = arith.constant 0 : i32
    return %c0_i32, %c0_i32_0 : i32, i32
  }
  func.func @transform_7(%arg0: i32, %arg1: i32) -> (i32, i32) {
    %c0_i32 = arith.constant 0 : i32
    %c0_i32_0 = arith.constant 0 : i32
    return %arg0, %c0_i32 : i32, i32
  }
}

</mosaic_0001>

<bundles_post_ra>
// kernel: mlp_layer_forward.1
= control target key start
LH: loop header
LB: loop body
LE: loop exit
PB: predicated region body
PF: predicated region fallthrough
CT: control target
= control target key end

     0   :  { %v438_v2 = vmov 0.0   ;;  %v41_v4 = vlaneseq  ;;  %vm439_vm1 = vmmov 0   ;;  %s580_s0 = inlined_call_operand.vmem [shape: f32[16,128], index: 0, kind: input, shape index: {}]   ;;  %s581_s3 = inlined_call_operand.vmem [shape: bf16[128,128], index: 3, kind: input, shape index: {}]   ;;  %s582_s1 = inlined_call_operand.vmem [shape: f32[1,128], index: 1, kind: input, shape index: {}]   ;;  %s583_s2 = inlined_call_operand.vmem [shape: f32[1,128], index: 2, kind: input, shape index: {}]   ;;  %s584_s5 = inlined_call_operand.vmem [shape: bf16[128,128], index: 5, kind: input, shape index: {}]   ;;  %s585_s4 = inlined_call_operand.vmem [shape: f32[1,128], index: 4, kind: input, shape index: {}]   ;;  %s586_s6 = inlined_call_operand.vmem [shape: f32[1,128], index: 6, kind: input, shape index: {}]   ;;  %s587_s7 = inlined_call_operand.vmem [shape: f32[16,128], index: 7, kind: output, shape index: {}]  }
   0x1   :  { %v483_v0 = vld [vmem:[%s580_s0] sm:$0xff]  ;;  %v489_v1 = vld [vmem:[%s580_s0 + $0x8] sm:$0xff]  ;;  %372 = vmatprep.subr.bf16.mxu0 %v438_v2  ;;  %392 = vmatprep.subr.bf16.mxu1 %v438_v2  ;;  %v416_v17 = vld [vmem:[%s581_s3 + $0x10] sm:$0xff]  }
   0x2   :  { %33 = vadd.xlane.f32.xlu0 %v483_v0  ;;  %v414_v3 = vld [vmem:[%s581_s3] sm:$0xff]   ;;  %v42_v5 = vand.u32 127, %v41_v4  ;;  %v415_v16 = vld [vmem:[%s581_s3 + $0x8] sm:$0xff]   ;;  %v417_v18 = vld [vmem:[%s581_s3 + $0x18] sm:$0xff]   ;;  %388 = vmatprep.mubr.msk.bf16.mxu0 %vm439_vm1, %v438_v2 }
   0x3   :  { %373 = vmatpush3.bf16.msra.mxu0 %v414_v3  ;;  %v418_v19 = vld [vmem:[%s581_s3 + $0x20] sm:$0xff]   ;;  %408 = vmatprep.mubr.msk.bf16.mxu1 %vm439_vm1, %v438_v2  ;;  %v419_v20 = vld [vmem:[%s581_s3 + $0x28] sm:$0xff]   ;;  %v420_v21 = vld [vmem:[%s581_s3 + $0x30] sm:$0xff]  }
   0x4   :  { %374 = vmatprep.subr.bf16.mxu0 %v438_v2  ;;  %vm43_vm0 = vcmp.lt.s32.totalorder %v42_v5, 32  ;;  %v421_v22 = vld [vmem:[%s581_s3 + $0x38] sm:$0xff]   ;;  %v334_v31 = vld [vmem:[%s582_s1] ss:$0 sm:$0xff]  ;;  %v423_v41 = vld [vmem:[%s584_s5 + $0x8] sm:$0xff]  }
   0x5   :  { %v335_v35 = vld [vmem:[%s583_s2] ss:$0 sm:$0xff]  ;;  %v424_v42 = vld [vmem:[%s584_s5 + $0x10] sm:$0xff]   ;;  %v425_v43 = vld [vmem:[%s584_s5 + $0x18] sm:$0xff]  }
   0x6   :  { %35 = vadd.xlane.f32.xlu0 %v489_v1  ;;  %v422_v40 = vld [vmem:[%s584_s5] sm:$0xff]   ;;  %v427_v45 = vld [vmem:[%s584_s5 + $0x28] sm:$0xff]   ;;  %v428_v46 = vld [vmem:[%s584_s5 + $0x30] sm:$0xff]  }
   0x7   :  { %375 = vmatpush3.bf16.msra.mxu0 %v415_v16  ;;  %393 = vmatpush3.bf16.msra.mxu1 %v422_v40  ;;  %v426_v44 = vld [vmem:[%s584_s5 + $0x20] sm:$0xff]   ;;  %v429_v47 = vld [vmem:[%s584_s5 + $0x38] sm:$0xff]  }
   0x8   :  { %376 = vmatprep.subr.bf16.mxu0 %v438_v2  ;;  %394 = vmatprep.subr.bf16.mxu1 %v438_v2  ;;  %v336_v48 = vld [vmem:[%s585_s4] ss:$0 sm:$0xff] }
   0xb   :  { %377 = vmatpush3.bf16.msra.mxu0 %v416_v17  ;;  %395 = vmatpush3.bf16.msra.mxu1 %v423_v41 }
   0xc   :  { %378 = vmatprep.subr.bf16.mxu0 %v438_v2  ;;  %396 = vmatprep.subr.bf16.mxu1 %v438_v2 }
   0xf   :  { %379 = vmatpush3.bf16.msra.mxu0 %v417_v18  ;;  %397 = vmatpush3.bf16.msra.mxu1 %v424_v42 }
  0x10   :  { %380 = vmatprep.subr.bf16.mxu0 %v438_v2  ;;  %398 = vmatprep.subr.bf16.mxu1 %v438_v2 }
  0x13   :  { %381 = vmatpush3.bf16.msra.mxu0 %v418_v19  ;;  %399 = vmatpush3.bf16.msra.mxu1 %v425_v43 }
  0x14   :  { %382 = vmatprep.subr.bf16.mxu0 %v438_v2  ;;  %400 = vmatprep.subr.bf16.mxu1 %v438_v2 }
  0x17   :  { %383 = vmatpush3.bf16.msra.mxu0 %v419_v20  ;;  %401 = vmatpush3.bf16.msra.mxu1 %v426_v44 }
  0x18   :  { %384 = vmatprep.subr.bf16.mxu0 %v438_v2  ;;  %402 = vmatprep.subr.bf16.mxu1 %v438_v2 }
  0x1b   :  { %385 = vmatpush3.bf16.msra.mxu0 %v420_v21  ;;  %403 = vmatpush3.bf16.msra.mxu1 %v427_v45 }
  0x1c   :  { %386 = vmatprep.subr.bf16.mxu0 %v438_v2  ;;  %404 = vmatprep.subr.bf16.mxu1 %v438_v2 }
  0x1f   :  { %387 = vmatpush3.bf16.msra.mxu0 %v421_v22  ;;  %405 = vmatpush3.bf16.msra.mxu1 %v428_v46 }
  0x20   :  { %406 = vmatprep.subr.bf16.mxu1 %v438_v2 }
  0x23   :  { %407 = vmatpush3.bf16.msra.mxu1 %v429_v47 }
  0x8f   :  { %v34_v6 = vpop.xlane.xlu0 %33 }
  0x90   :  { %v37_v7 = vmul.f32 0.03125, %v34_v6 }
  0x92   :  { %v39_v8 = vsub.f32 %v483_v0, %v37_v7 }
  0x93   :  { %v36_v9 = vpop.xlane.xlu0 %35 }
  0x94   :  { %v38_v10 = vmul.f32 0.03125, %v36_v9  ;;  %v44_v11 = vsel %vm43_vm0, %v39_v8, 0.0 }
  0x95   :  { %v46_v12 = vmul.f32 %v44_v11, %v44_v11 }
  0x96   :  { %v40_v13 = vsub.f32 %v489_v1, %v38_v10 }
  0x97   :  { %48 = vadd.xlane.f32.xlu1 %v46_v12  ;;  %v345_v12 = vld [vmem:[%s586_s6] ss:$0 sm:$0xff] }
  0x98   :  { %v45_v14 = vsel %vm43_vm0, %v40_v13, 0.0 }
  0x99   :  { %v47_v15 = vmul.f32 %v45_v14, %v45_v14 }
  0x9b   :  { %50 = vadd.xlane.f32.xlu1 %v47_v15 }
 0x124   :  { %v49_v23 = vpop.xlane.xlu1 %48 }
 0x125   :  { %v52_v24 = vmul.f32 0.03125, %v49_v23 }
 0x127   :  { %v54_v25 = vadd.f32 1e-05, %v52_v24 }
 0x128   :  { %v51_v26 = vpop.xlane.xlu1 %50 }
 0x129   :  { %430 = vrsqrt.f32 %v54_v25  ;;  %v53_v27 = vmul.f32 0.03125, %v51_v26 }
 0x12b   :  { %v55_v28 = vadd.f32 1e-05, %v53_v27 }
 0x12d   :  { %432 = vrsqrt.f32 %v55_v28 }
 0x133   :  { %v431_v29 = vpop.eup %430 }
 0x134   :  { %v58_v30 = vmul.f32 %v431_v29, %v44_v11 }
 0x136   :  { %v67_v34 = vmul.f32 %v334_v31, %v58_v30 }
 0x137   :  { %v433_v32 = vpop.eup %432 }
 0x138   :  { %v59_v33 = vmul.f32 %v433_v32, %v45_v14  ;;  %v76_v37 = vadd.f32 %v335_v35, %v67_v34 }
 0x13a   :  { %v68_v36 = vmul.f32 %v334_v31, %v59_v33 }
 0x13c   :  { %v77_v38 = vadd.f32 %v335_v35, %v68_v36 }
 0x13e   :  { %v78_v39 = vpack.c.bf16 %v77_v38, %v76_v37 }
 0x140   :  { %389 = vmatmul.mubr.bf16.vlgmr.msra.gmra.mrb[0].mxu0 %v78_v39 }
 0x213   :  { %v186_v49 = vpop.f32.mrb[0].mxu0 }
 0x214   :  { %v187_v50 = vadd.f32 %v336_v48, %v186_v49  ;;  %v390_v51 = vpop.f32.mrb[1].mxu0 }
 0x215   :  { %v189_v52 = vpop.f32.mrb[2].mxu0 }
 0x216   :  { %v193_v53 = vmul.f32 %v187_v50, %v187_v50  ;;  %v190_v54 = vadd.f32 %v336_v48, %v189_v52  ;;  %v391_v55 = vpop.f32.mrb[3].mxu0 }
 0x218   :  { %v195_v56 = vmul.f32 %v193_v53, %v187_v50  ;;  %v194_v57 = vmul.f32 %v190_v54, %v190_v54 }
 0x21a   :  { %v197_v58 = vmul.f32 0.044715, %v195_v56  ;;  %v196_v59 = vmul.f32 %v194_v57, %v190_v54 }
 0x21c   :  { %v199_v60 = vadd.f32 %v197_v58, %v187_v50  ;;  %v198_v61 = vmul.f32 0.044715, %v196_v59 }
 0x21e   :  { %v201_v62 = vmul.f32 0.7978846, %v199_v60  ;;  %v200_v63 = vadd.f32 %v198_v61, %v190_v54 }
 0x220   :  { %434 = vtanh.f32 %v201_v62  ;;  %v202_v2 = vmul.f32 0.7978846, %v200_v63 }
 0x222   :  { %436 = vtanh.f32 %v202_v2 }
 0x22a   :  { %v435_v3 = vpop.eup %434 }
 0x22b   :  { %v205_v4 = vadd.f32 1.0, %v435_v3 }
 0x22c   :  { %v437_v5 = vpop.eup %436 }
 0x22d   :  { %v206_v6 = vadd.f32 1.0, %v437_v5  ;;  %v207_v7 = vmul.f32 0.5, %v205_v4 }
 0x22f   :  { %v208_v8 = vmul.f32 0.5, %v206_v6  ;;  %v209_v9 = vmul.f32 %v207_v7, %v187_v50 }
 0x231   :  { %v210_v10 = vmul.f32 %v208_v8, %v190_v54 }
 0x233   :  { %v211_v11 = vpack.c.bf16 %v210_v10, %v209_v9 }
 0x235   :  { %409 = vmatmul.mubr.bf16.vlgmr.msra.gmra.mrb[0].mxu1 %v211_v11 }
 0x308   :  { %v317_v13 = vpop.f32.mrb[0].mxu1 }
 0x309   :  { %v318_v14 = vadd.f32 %v345_v12, %v317_v13  ;;  %v410_v15 = vpop.f32.mrb[1].mxu1 }
 0x30a   :  { %v320_v16 = vpop.f32.mrb[2].mxu1 }
 0x30b   :  { %v326_v17 = vadd.f32 %v318_v14, %v483_v0  ;;  %v321_v18 = vadd.f32 %v345_v12, %v320_v16  ;;  %v411_v19 = vpop.f32.mrb[3].mxu1 }
 0x30d   :  { %328 = vst [vmem:[%s587_s7] sm:$0xff] %v326_v17  ;;  %v327_v20 = vadd.f32 %v321_v18, %v489_v1 }
 0x30f   :  { %329 = vst [vmem:[%s587_s7 + $0x8] sm:$0xff] %v327_v20 }

</bundles_post_ra>
